<compile_context>
chip_gen: v7x
topology: tpu7x:2x2x1
jax: 0.10.0
libtpu: 0.0.40
codegen_flags: <defaults>
</compile_context>

<pallas_src>
import functools

import jax
import jax.numpy as jnp
from jax.experimental import pallas as pl
from jax.experimental.pallas import tpu as pltpu

# ---- Fixed, padded compute geometry (batch lives on the 128-lane axis) ----
LANE = 128                   # batch-tile granularity on the lane axis
K1_PAD = 16                  # state_dim (4) zero-padded to 16 sublanes (bf16 pack = 16)
H_PAD = 128                  # hidden (64) zero-padded to 128 sublanes
W3_ROWS = 16                 # fc3 rows in the packed slab (16-aligned for bf16 packing)
W23_ROWS = H_PAD + W3_ROWS   # 144-row bf16 slab: [W2 ; W3]
Q_ROWS = 8                   # output sublane rows (action_dim=2 padded to 8) -> 32 B/row
B_COLS = 8                   # f32 bias slab columns (col 0 = b1, 1 = b2, 2 = b3)


def qnet_kernel(x_ref, w1_ref, w23_ref, b_ref, o_ref):
    # x_ref:   (K1_PAD, tb)      bf16  transposed, zero-padded state batch tile
    # w1_ref:  (H_PAD, K1_PAD)   bf16  fc1 weight, (out, in) layout, VMEM-resident
    # w23_ref: (W23_ROWS, H_PAD) bf16  rows 0:128 = fc2, rows 128:144 = fc3, resident
    # b_ref:   (H_PAD, B_COLS)   f32   col 0 = b1, col 1 = b2, col 2 = b3, resident
    # o_ref:   (Q_ROWS, tb)      f32   rows 0..action_dim-1 hold the Q-values
    x = x_ref[...]
    w1 = w1_ref[...]
    w2 = w23_ref[0:H_PAD, :]            # 16-aligned static slices: zero-cost views
    w3 = w23_ref[H_PAD:W23_ROWS, :]
    b = b_ref[...]

    # fc1 + ReLU: bf16 MXU operands, f32 accumulate; bias/ReLU stay f32 on the VPU.
    h1 = jnp.dot(w1, x, preferred_element_type=jnp.float32)            # (H_PAD, tb)
    h1 = jnp.maximum(h1 + b[:, 0:1], 0.0)
    # fc2 + ReLU
    h2 = jnp.dot(w2, h1.astype(jnp.bfloat16), preferred_element_type=jnp.float32)
    h2 = jnp.maximum(h2 + b[:, 1:2], 0.0)
    # fc3 (Q-values, no activation); keep the first Q_ROWS sublanes (free f32 vreg slice)
    q = jnp.dot(w3, h2.astype(jnp.bfloat16), preferred_element_type=jnp.float32)  # (16, tb)
    o_ref[...] = q[0:Q_ROWS, :] + b[0:Q_ROWS, 2:3]


def pack_params(params, state_dim, action_dim, hidden=64):
    """Pack the 6 weight/bias arrays into 3 padded, VMEM-resident slabs.

    Weights go into bf16 slabs in (out, in) orientation so the kernel runs the whole
    net in the transposed (features-on-sublanes, batch-on-lanes) layout; biases stay f32.
    """
    w1, b1, w2, b2, w3, b3 = params          # w* in (in, out) layout, b* shape (1, out)

    w1p = jnp.zeros((H_PAD, K1_PAD), jnp.float32)
    w1p = w1p.at[:hidden, :state_dim].set(w1.T).astype(jnp.bfloat16)

    w23 = jnp.zeros((W23_ROWS, H_PAD), jnp.float32)
    w23 = w23.at[0:hidden, 0:hidden].set(w2.T)
    w23 = w23.at[H_PAD:H_PAD + action_dim, 0:hidden].set(w3.T)
    w23 = w23.astype(jnp.bfloat16)

    b = jnp.zeros((H_PAD, B_COLS), jnp.float32)
    b = b.at[0:hidden, 0].set(jnp.reshape(b1, (-1,)))
    b = b.at[0:hidden, 1].set(jnp.reshape(b2, (-1,)))
    b = b.at[0:action_dim, 2].set(jnp.reshape(b3, (-1,)))
    return w1p, w23, b


@functools.partial(jax.jit, static_argnames=("action_dim", "block_b"))
def qnetwork_forward(x, w1p, w23p, b_slab, *, action_dim, block_b=4096):
    """Fused 3-layer MLP forward. x: (B, state_dim) f32 -> (B, action_dim) f32."""
    B, F = x.shape
    assert F <= K1_PAD

    # Batch tile on the lane axis: always a multiple of 128, capped by block_b, and
    # ~half of the padded batch for mid-size batches so a v7x 2-TC grid splits evenly.
    b128 = -(-B // LANE) * LANE
    blk = max(LANE, -(-block_b // LANE) * LANE)
    half = -(-(b128 // 2) // LANE) * LANE
    tb = max(LANE, min(blk, half))
    assert tb % LANE == 0
    b_pad = -(-b128 // tb) * tb
    grid = (b_pad // tb,)

    # Single fused pre-pass over x: cast to bf16, transpose to (features, batch),
    # zero-pad features -> K1_PAD and batch -> b_pad (exact: padded weight cols are 0).
    x_t = jnp.pad(x.astype(jnp.bfloat16).T, ((0, K1_PAD - F), (0, b_pad - B)))

    out = pl.pallas_call(
        qnet_kernel,
        out_shape=jax.ShapeDtypeStruct((Q_ROWS, b_pad), jnp.float32),
        grid_spec=pltpu.PrefetchScalarGridSpec(
            num_scalar_prefetch=0,
            grid=grid,
            in_specs=[
                pl.BlockSpec((K1_PAD, tb), lambda i: (0, i)),       # batch tile (lane-dense)
                pl.BlockSpec((H_PAD, K1_PAD), lambda i: (0, 0)),    # fc1 weights: resident
                pl.BlockSpec((W23_ROWS, H_PAD), lambda i: (0, 0)),  # fc2|fc3 slab: resident
                pl.BlockSpec((H_PAD, B_COLS), lambda i: (0, 0)),    # f32 biases: resident
            ],
            out_specs=pl.BlockSpec((Q_ROWS, tb), lambda i: (0, i)),  # 8 x tb f32 writeback
        ),
        compiler_params=pltpu.CompilerParams(
            dimension_semantics=("parallel",),   # v7x: batch tiles split across both TCs
        ),
    )(x_t, w1p, w23p, b_slab)

    # Back to PyTorch layout: (B, action_dim).
    return out[:action_dim, :B].T


def init_params(key, state_dim, action_dim, hidden=64):
    """Deterministic init matching PyTorch nn.Linear default (U[-1/sqrt(fan_in), +...])."""
    ks = jax.random.split(key, 6)

    def linear(kw, kb, fan_in, fan_out):
        bound = 1.0 / jnp.sqrt(jnp.float32(fan_in))
        w = jax.random.uniform(kw, (fan_in, fan_out), jnp.float32, -bound, bound)
        b = jax.random.uniform(kb, (1, fan_out), jnp.float32, -bound, bound)
        return w, b

    w1, b1 = linear(ks[0], ks[1], state_dim, hidden)
    w2, b2 = linear(ks[2], ks[3], hidden, hidden)
    w3, b3 = linear(ks[4], ks[5], hidden, action_dim)
    return (w1, b1, w2, b2, w3, b3)


def reference_forward(x, params):
    w1, b1, w2, b2, w3, b3 = params
    h1 = jnp.maximum(x @ w1 + b1, 0.0)
    h2 = jnp.maximum(h1 @ w2 + b2, 0.0)
    return h2 @ w3 + b3


if __name__ == "__main__":
    key = jax.random.PRNGKey(0)
    k_x, k_p, k_x2 = jax.random.split(key, 3)

    # CartPole: state_shape=4, action_shape=2.
    state_dim, action_dim = 4, 2
    params = init_params(k_p, state_dim, action_dim)
    w1p, w23p, b_slab = pack_params(params, state_dim, action_dim)

    # Small eval batch (single grid step; batch padded to one 128-lane tile).
    x_small = jax.random.normal(k_x, (8, state_dim), dtype=jnp.float32)
    q_small = qnetwork_forward(x_small, w1p, w23p, b_slab, action_dim=action_dim)
    jax.block_until_ready(q_small)
    q_ref_small = reference_forward(x_small, params)
    assert q_small.shape == (8, action_dim)
    assert jnp.allclose(q_small, q_ref_small, atol=3e-2, rtol=3e-2)

    # Larger, non-multiple batch exercising the multi-step batch grid + padding path.
    x_big = jax.random.normal(k_x2, (300, state_dim), dtype=jnp.float32)
    q_big = qnetwork_forward(x_big, w1p, w23p, b_slab, action_dim=action_dim, block_b=128)
    jax.block_until_ready(q_big)
    q_ref_big = reference_forward(x_big, params)
    assert q_big.shape == (300, action_dim)
    assert jnp.allclose(q_big, q_ref_big, atol=3e-2, rtol=3e-2)

    print("KERNEL_OK")
</pallas_src>

<mosaic_0001>
module attributes {stable_mosaic.version = 11 : i64} {
  func.func @qnet_kernel(%arg0: i32, %arg1: memref<16x128xbf16, #tpu.memory_space<vmem>>, %arg2: memref<128x16xbf16, #tpu.memory_space<vmem>>, %arg3: memref<144x128xbf16, #tpu.memory_space<vmem>>, %arg4: memref<128x8xf32, #tpu.memory_space<vmem>>, %arg5: memref<8x128xf32, #tpu.memory_space<vmem>>) attributes {dimension_semantics = [#tpu.dimension_semantics<parallel>], iteration_bounds = array<i64: 1>, scalar_prefetch = 0 : i64, scratch_operands = 0 : i64, tpu.core_type = #tpu.core_type<tc>, window_params = [{transform_indices = @transform_0, window_bounds = array<i64: 16, 128>}, {pipeline_mode = #tpu.pipeline_mode<synchronous>, transform_indices = @transform_1, window_bounds = array<i64: 128, 16>}, {pipeline_mode = #tpu.pipeline_mode<synchronous>, transform_indices = @transform_2, window_bounds = array<i64: 144, 128>}, {pipeline_mode = #tpu.pipeline_mode<synchronous>, transform_indices = @transform_3, window_bounds = array<i64: 128, 8>}, {transform_indices = @transform_4, window_bounds = array<i64: 8, 128>}]} {
    %c0 = arith.constant 0 : index
    %c0_0 = arith.constant 0 : index
    %0 = vector.load %arg1[%c0, %c0_0] : memref<16x128xbf16, #tpu.memory_space<vmem>>, vector<16x128xbf16>
    %c0_1 = arith.constant 0 : index
    %c0_2 = arith.constant 0 : index
    %1 = vector.load %arg2[%c0_1, %c0_2] : memref<128x16xbf16, #tpu.memory_space<vmem>>, vector<128x16xbf16>
    %c0_3 = arith.constant 0 : index
    %c0_4 = arith.constant 0 : index
    %2 = vector.load %arg3[%c0_3, %c0_4] : memref<144x128xbf16, #tpu.memory_space<vmem>>, vector<128x128xbf16>
    %c128 = arith.constant 128 : index
    %c0_5 = arith.constant 0 : index
    %3 = vector.load %arg3[%c128, %c0_5] : memref<144x128xbf16, #tpu.memory_space<vmem>>, vector<16x128xbf16>
    %c0_6 = arith.constant 0 : index
    %c0_7 = arith.constant 0 : index
    %4 = vector.load %arg4[%c0_6, %c0_7] : memref<128x8xf32, #tpu.memory_space<vmem>>, vector<128x8xf32>
    %cst = arith.constant dense<0.000000e+00> : vector<128x128xf32>
    %5 = tpu.matmul %1, %0, %cst {dimension_numbers = #tpu.dot_dimension_numbers<[1], [0], [0], [1], [0, 0, 1, 1], [], []>} : vector<128x16xbf16>, vector<16x128xbf16>, vector<128x128xf32> -> vector<128x128xf32>
    %6 = vector.extract_strided_slice %4 {offsets = [0, 0], sizes = [128, 1], strides = [1, 1]} : vector<128x8xf32> to vector<128x1xf32>
    %7 = vector.broadcast %6 : vector<128x1xf32> to vector<128x128xf32>
    %8 = arith.addf %5, %7 : vector<128x128xf32>
    %cst_8 = arith.constant 0.000000e+00 : f32
    %9 = vector.broadcast %cst_8 : f32 to vector<128x128xf32>
    %10 = arith.maximumf %8, %9 : vector<128x128xf32>
    %11 = arith.truncf %10 : vector<128x128xf32> to vector<128x128xbf16>
    %cst_9 = arith.constant dense<0.000000e+00> : vector<128x128xf32>
    %12 = tpu.matmul %2, %11, %cst_9 {dimension_numbers = #tpu.dot_dimension_numbers<[1], [0], [0], [1], [0, 0, 1, 1], [], []>} : vector<128x128xbf16>, vector<128x128xbf16>, vector<128x128xf32> -> vector<128x128xf32>
    %13 = vector.extract_strided_slice %4 {offsets = [0, 1], sizes = [128, 1], strides = [1, 1]} : vector<128x8xf32> to vector<128x1xf32>
    %14 = vector.broadcast %13 : vector<128x1xf32> to vector<128x128xf32>
    %15 = arith.addf %12, %14 : vector<128x128xf32>
    %cst_10 = arith.constant 0.000000e+00 : f32
    %16 = vector.broadcast %cst_10 : f32 to vector<128x128xf32>
    %17 = arith.maximumf %15, %16 : vector<128x128xf32>
    %18 = arith.truncf %17 : vector<128x128xf32> to vector<128x128xbf16>
    %cst_11 = arith.constant dense<0.000000e+00> : vector<16x128xf32>
    %19 = tpu.matmul %3, %18, %cst_11 {dimension_numbers = #tpu.dot_dimension_numbers<[1], [0], [0], [1], [0, 0, 1, 1], [], []>} : vector<16x128xbf16>, vector<128x128xbf16>, vector<16x128xf32> -> vector<16x128xf32>
    %20 = vector.extract_strided_slice %19 {offsets = [0, 0], sizes = [8, 128], strides = [1, 1]} : vector<16x128xf32> to vector<8x128xf32>
    %21 = vector.extract_strided_slice %4 {offsets = [0, 2], sizes = [8, 1], strides = [1, 1]} : vector<128x8xf32> to vector<8x1xf32>
    %22 = vector.broadcast %21 : vector<8x1xf32> to vector<8x128xf32>
    %23 = arith.addf %20, %22 : vector<8x128xf32>
    %c0_12 = arith.constant 0 : index
    %c0_13 = arith.constant 0 : index
    %24 = vector.load %arg5[%c0_12, %c0_13] : memref<8x128xf32, #tpu.memory_space<vmem>>, vector<8x128xf32>
    tpu.vector_store %arg5[%c0_12, %c0_13], %23 {strides = array<i32>} : memref<8x128xf32, #tpu.memory_space<vmem>>, vector<8x128xf32>,
    return
  }
  func.func @transform_0(%arg0: i32) -> (i32, i32) {
    %c0_i32 = arith.constant 0 : i32
    %c0_i32_0 = arith.constant 0 : i32
    return %c0_i32, %arg0 : i32, i32
  }
  func.func @transform_1(%arg0: i32) -> (i32, i32) {
    %c0_i32 = arith.constant 0 : i32
    %c0_i32_0 = arith.constant 0 : i32
    %c0_i32_1 = arith.constant 0 : i32
    return %c0_i32, %c0_i32_0 : i32, i32
  }
  func.func @transform_2(%arg0: i32) -> (i32, i32) {
    %c0_i32 = arith.constant 0 : i32
    %c0_i32_0 = arith.constant 0 : i32
    %c0_i32_1 = arith.constant 0 : i32
    return %c0_i32, %c0_i32_0 : i32, i32
  }
  func.func @transform_3(%arg0: i32) -> (i32, i32) {
    %c0_i32 = arith.constant 0 : i32
    %c0_i32_0 = arith.constant 0 : i32
    %c0_i32_1 = arith.constant 0 : i32
    return %c0_i32, %c0_i32_0 : i32, i32
  }
  func.func @transform_4(%arg0: i32) -> (i32, i32) {
    %c0_i32 = arith.constant 0 : i32
    %c0_i32_0 = arith.constant 0 : i32
    return %c0_i32, %arg0 : i32, i32
  }
}

</mosaic_0001>

<bundles_post_ra>
// kernel: qnetwork_forward.1
= control target key start
LH: loop header
LB: loop body
LE: loop exit
PB: predicated region body
PF: predicated region fallthrough
CT: control target
= control target key end

     0   :  { %vm196_vm0 = vcmask 130048   ;;  %v790_v1 = vmov 0   ;;  %v791_v27 = vmov 1   ;;  %vm793_vm1 = vmmov 0   ;;  %s947_s0 = inlined_call_operand.vmem [shape: bf16[16,128], index: 0, kind: input, shape index: {}]   ;;  %s948_s1 = inlined_call_operand.vmem [shape: bf16[128,16], index: 1, kind: input, shape index: {}]   ;;  %s949_s3 = inlined_call_operand.vmem [shape: f32[128,8], index: 3, kind: input, shape index: {}]   ;;  %s950_s2 = inlined_call_operand.vmem [shape: bf16[144,128], index: 2, kind: input, shape index: {}]   ;;  %s951_s4 = inlined_call_operand.vmem [shape: f32[8,128], index: 4, kind: output, shape index: {}]  }
   0x1   :  { %v772_v0 = vld [vmem:[%s947_s0] sm:$0xff]   ;;  %766 = vset.pattern.permute.xlu0 %v790_v1  ;;  %767 = vset.pattern.permute.xlu1 %v790_v1  ;;  %v774_v3 = vld [vmem:[%s948_s1 + $0x8] sm:$0xff]   ;;  %v775_v4 = vld [vmem:[%s948_s1 + $0x10] sm:$0xff]  }
   0x2   :  { %v773_v2 = vld [vmem:[%s948_s1] sm:$0xff]   ;;  %691 = vmatprep.subr.bf16.mxu0 %v772_v0  ;;  %v56_v6 = vld [vmem:[%s949_s3 + $0x10] sm:$0xff]  ;;  %v776_v7 = vld [vmem:[%s948_s1 + $0x18] sm:$0xff]  }
   0x3   :  { %692 = vmatpush3.bf16.msra.mxu0 %v772_v0  ;;  %693 = vmatprep.mubr.msk.bf16.mxu0 %vm196_vm0, %v773_v2  ;;  %v838_v5 = vld [vmem:[%s949_s3] sm:$0xff]  ;;  %v55_v9 = vld [vmem:[%s949_s3 + $0x8] sm:$0xff]  ;;  %v57_v10 = vld [vmem:[%s949_s3 + $0x18] sm:$0xff] }
   0x4   :  { %72 = vperm.xlu0 %766, %v838_v5   ;;  %82 = vperm.xlu1 %767, %v56_v6   ;;  %v777_v8 = vld [vmem:[%s948_s1 + $0x20] sm:$0xff]   ;;  %v59_v12 = vld [vmem:[%s949_s3 + $0x28] sm:$0xff]  ;;  %v779_v14 = vld [vmem:[%s948_s1 + $0x30] sm:$0xff]  }
   0x5   :  { %v58_v11 = vld [vmem:[%s949_s3 + $0x20] sm:$0xff]  ;;  %v778_v13 = vld [vmem:[%s948_s1 + $0x28] sm:$0xff]   ;;  %v60_v15 = vld [vmem:[%s949_s3 + $0x30] sm:$0xff] }
   0x6   :  { %694 = vmatmul.mubr.msk.bf16.vlgmr.msra.gmra.mrb[0].mxu0 %vm196_vm0, %v774_v3  ;;  %v61_v16 = vld [vmem:[%s949_s3 + $0x38] sm:$0xff]  ;;  %v62_v17 = vld [vmem:[%s949_s3 + $0x40] sm:$0xff]  ;;  %v63_v18 = vld [vmem:[%s949_s3 + $0x48] sm:$0xff] }
   0x7   :  { %697 = vmatprep.mubr.msk.bf16.mxu0 %vm196_vm0, %v775_v4  ;;  %v780_v19 = vld [vmem:[%s948_s1 + $0x38] sm:$0xff]   ;;  %v64_v20 = vld [vmem:[%s949_s3 + $0x50] sm:$0xff]  ;;  %v66_v22 = vld [vmem:[%s949_s3 + $0x60] sm:$0xff] }
   0x8   :  { %77 = vperm.xlu0 %766, %v55_v9   ;;  %87 = vperm.xlu1 %767, %v57_v10   ;;  %v65_v21 = vld [vmem:[%s949_s3 + $0x58] sm:$0xff]  ;;  %v67_v23 = vld [vmem:[%s949_s3 + $0x68] sm:$0xff]  ;;  %v68_v24 = vld [vmem:[%s949_s3 + $0x70] sm:$0xff] }
   0x9   :  { %v69_v25 = vld [vmem:[%s949_s3 + $0x78] sm:$0xff]  ;;  %v781_v26 = vld [vmem:[%s950_s2] sm:$0xff]  }
   0xa   :  { %725 = vmatprep.mubr.bf16.mxu1 %v781_v26 }
   0xc   :  { %92 = vperm.xlu0 %766, %v58_v11   ;;  %97 = vperm.xlu1 %767, %v59_v12  }
   0xe   :  { %698 = vmatmul.mubr.msk.bf16.gmra.mrb[4].mxu0 %vm196_vm0, %v776_v7 }
   0xf   :  { %701 = vmatprep.mubr.msk.bf16.mxu0 %vm196_vm0, %v777_v8 }
  0x10   :  { %102 = vperm.xlu0 %766, %v60_v15   ;;  %107 = vperm.xlu1 %767, %v61_v16  }
  0x14   :  { %112 = vperm.xlu0 %766, %v62_v17   ;;  %117 = vperm.xlu1 %767, %v63_v18  }
  0x16   :  { %702 = vmatmul.mubr.msk.bf16.gmra.mrb[8].mxu0 %vm196_vm0, %v778_v13 }
  0x17   :  { %705 = vmatprep.mubr.msk.bf16.mxu0 %vm196_vm0, %v779_v14 }
  0x18   :  { %122 = vperm.xlu0 %766, %v64_v20   ;;  %127 = vperm.xlu1 %767, %v65_v21  }
  0x1c   :  { %132 = vperm.xlu0 %766, %v66_v22   ;;  %137 = vperm.xlu1 %767, %v67_v23  }
  0x1e   :  { %706 = vmatmul.mubr.msk.bf16.gmra.mrb[12].mxu0 %vm196_vm0, %v780_v19 }
  0x20   :  { %142 = vperm.xlu0 %766, %v68_v24   ;;  %147 = vperm.xlu1 %767, %v69_v25  }
  0x24   :  { %769 = vset.pattern.permute.xlu1 %v791_v27  ;;  %768 = vset.pattern.permute.xlu0 %v791_v27 }
  0x25   :  { %347 = vperm.xlu1 %769, %v55_v9   ;;  %343 = vperm.xlu0 %768, %v838_v5  }
  0x29   :  { %351 = vperm.xlu1 %769, %v56_v6   ;;  %355 = vperm.xlu0 %768, %v57_v10  }
  0x2d   :  { %359 = vperm.xlu1 %769, %v58_v11   ;;  %363 = vperm.xlu0 %768, %v59_v12  }
  0x31   :  { %367 = vperm.xlu1 %769, %v60_v15   ;;  %371 = vperm.xlu0 %768, %v61_v16  }
  0x35   :  { %375 = vperm.xlu1 %769, %v62_v17   ;;  %379 = vperm.xlu0 %768, %v63_v18  }
  0x39   :  { %383 = vperm.xlu1 %769, %v64_v20   ;;  %387 = vperm.xlu0 %768, %v65_v21  }
  0x3d   :  { %391 = vperm.xlu1 %769, %v66_v22   ;;  %395 = vperm.xlu0 %768, %v67_v23  }
  0x41   :  { %399 = vperm.xlu1 %769, %v68_v24   ;;  %403 = vperm.xlu0 %768, %v69_v25  }
  0x83   :  { %v73_v28 = vpop.permute.xlu0 %72  ;;  %v83_v29 = vpop.permute.xlu1 %82 }
  0x87   :  { %v78_v30 = vpop.permute.xlu0 %77  ;;  %v88_v31 = vpop.permute.xlu1 %87 }
  0x8b   :  { %v93_v32 = vpop.permute.xlu0 %92  ;;  %v98_v33 = vpop.permute.xlu1 %97 }
  0x8f   :  { %v103_v34 = vpop.permute.xlu0 %102  ;;  %v108_v38 = vpop.permute.xlu1 %107 }
  0x93   :  { %v113_v46 = vpop.permute.xlu0 %112  ;;  %v118_v50 = vpop.permute.xlu1 %117 }
  0x97   :  { %v123_v59 = vpop.permute.xlu0 %122  ;;  %v128_v63 = vpop.permute.xlu1 %127 }
  0x9b   :  { %v133_v8 = vpop.permute.xlu0 %132  ;;  %v138_v13 = vpop.permute.xlu1 %137 }
  0x9f   :  { %v143_v20 = vpop.permute.xlu0 %142  ;;  %v148_v25 = vpop.permute.xlu1 %147 }
  0xd9   :  { %v695_v35 = vpop.f32.mrb[0].mxu0 }
  0xda   :  { %v264_v36 = vadd.f32 %v695_v35, %v83_v29  ;;  %v255_v37 = vpop.f32.mrb[1].mxu0 }
  0xdb   :  { %v256_v39 = vadd.f32 %v255_v37, %v73_v28  ;;  %v696_v40 = vpop.f32.mrb[2].mxu0  ;;  %v782_v37 = vld [vmem:[%s950_s2 + $0x8] sm:$0xff]  }
  0xdc   :  { %v267_v41 = vadd.f32 %v696_v40, %v88_v31  ;;  %v258_v42 = vpop.f32.mrb[3].mxu0  ;;  %v320_v44 = vmax.f32 %v264_v36, 0.0  ;;  %v785_v40 = vld [vmem:[%s950_s2 + $0x20] sm:$0xff]  }
  0xdd   :  { %v259_v43 = vadd.f32 %v258_v42, %v78_v30  ;;  %v318_v47 = vmax.f32 %v256_v39, 0.0  ;;  %v784_v39 = vld [vmem:[%s950_s2 + $0x18] sm:$0xff]   ;;  %v787_v42 = vld [vmem:[%s950_s2 + $0x30] sm:$0xff]  }
  0xde   :  { %v321_v45 = vmax.f32 %v267_v41, 0.0  ;;  %v786_v41 = vld [vmem:[%s950_s2 + $0x28] sm:$0xff]  }
  0xdf   :  { %v319_v48 = vmax.f32 %v259_v43, 0.0  ;;  %v788_v43 = vld [vmem:[%s950_s2 + $0x38] sm:$0xff]  }
  0xe0   :  { %v335_v49 = vpack.c.bf16 %v321_v45, %v320_v44  ;;  %v792_v44 = vmov 0.0   ;;  %v794_v45 = vmov 2  }
  0xe1   :  { %v699_v51 = vpop.f32.mrb[4].mxu0  ;;  %v334_v52 = vpack.c.bf16 %v319_v48, %v318_v47  ;;  %741 = vmatprep.subr.bf16.mxu0 %v792_v44  ;;  %757 = vmatprep.mubr.msk.bf16.mxu0 %vm793_vm1, %v792_v44  ;;  %v344_v47 = vpop.permute.xlu0 %343 }
  0xe2   :  { %v280_v53 = vadd.f32 %v699_v51, %v103_v34  ;;  %v271_v54 = vpop.f32.mrb[5].mxu0  ;;  %770 = vset.pattern.permute.xlu1 %v794_v45  ;;  %771 = vset.pattern.permute.xlu0 %v794_v45 }
  0xe3   :  { %v272_v55 = vadd.f32 %v271_v54, %v93_v32  ;;  %v700_v56 = vpop.f32.mrb[6].mxu0  ;;  %709 = vmatprep.subr.bf16.mxu1 %v334_v52  ;;  %622 = vperm.xlu1 %770, %v838_v5  }
  0xe4   :  { %v283_v57 = vadd.f32 %v700_v56, %v108_v38  ;;  %v274_v58 = vpop.f32.mrb[7].mxu0  ;;  %710 = vmatpush3.bf16.msra.mxu1 %v334_v52  ;;  %v324_v61 = vmax.f32 %v280_v53, 0.0  ;;  %v783_v38 = vld [vmem:[%s950_s2 + $0x10] sm:$0xff]  }
  0xe5   :  { %v275_v60 = vadd.f32 %v274_v58, %v98_v33  ;;  %711 = vmatprep.subr.bf16.mxu1 %v335_v49  ;;  %v322_v0 = vmax.f32 %v272_v55, 0.0 }
  0xe6   :  { %v325_v62 = vmax.f32 %v283_v57, 0.0 }
  0xe7   :  { %v323_v1 = vmax.f32 %v275_v60, 0.0 }
  0xe8   :  { %v337_v2 = vpack.c.bf16 %v325_v62, %v324_v61  ;;  %712 = vmatpush3.bf16.msra.mxu1 %v335_v49  ;;  %v356_v49 = vpop.permute.xlu0 %355 }
  0xe9   :  { %v336_v3 = vpack.c.bf16 %v323_v1, %v322_v0  ;;  %v703_v4 = vpop.f32.mrb[8].mxu0 }
  0xea   :  { %v296_v6 = vadd.f32 %v703_v4, %v123_v59  ;;  %v287_v7 = vpop.f32.mrb[9].mxu0 }
  0xeb   :  { %v288_v9 = vadd.f32 %v287_v7, %v113_v46  ;;  %v704_v10 = vpop.f32.mrb[10].mxu0  ;;  %713 = vmatprep.subr.bf16.mxu1 %v336_v3  ;;  %v348_v46 = vpop.permute.xlu1 %347 }
  0xec   :  { %v299_v11 = vadd.f32 %v704_v10, %v128_v63  ;;  %v290_v12 = vpop.f32.mrb[11].mxu0  ;;  %714 = vmatpush3.bf16.msra.mxu1 %v336_v3  ;;  %v328_v15 = vmax.f32 %v296_v6, 0.0  ;;  %v364_v51 = vpop.permute.xlu0 %363 }
  0xed   :  { %v291_v14 = vadd.f32 %v290_v12, %v118_v50  ;;  %715 = vmatprep.subr.bf16.mxu1 %v337_v2  ;;  %v326_v17 = vmax.f32 %v288_v9, 0.0 }
  0xee   :  { %v329_v16 = vmax.f32 %v299_v11, 0.0 }
  0xef   :  { %v327_v18 = vmax.f32 %v291_v14, 0.0  ;;  %v352_v48 = vpop.permute.xlu1 %351 }
  0xf0   :  { %v339_v19 = vpack.c.bf16 %v329_v16, %v328_v15  ;;  %716 = vmatpush3.bf16.msra.mxu1 %v337_v2  ;;  %v372_v56 = vpop.permute.xlu0 %371 }
  0xf1   :  { %v338_v21 = vpack.c.bf16 %v327_v18, %v326_v17  ;;  %v707_v22 = vpop.f32.mrb[12].mxu0 }
  0xf2   :  { %v312_v23 = vadd.f32 %v707_v22, %v143_v20  ;;  %v303_v24 = vpop.f32.mrb[13].mxu0 }
  0xf3   :  { %v304_v26 = vadd.f32 %v303_v24, %v133_v8  ;;  %v708_v27 = vpop.f32.mrb[14].mxu0  ;;  %717 = vmatprep.subr.bf16.mxu1 %v338_v21  ;;  %v360_v50 = vpop.permute.xlu1 %359 }
  0xf4   :  { %v315_v28 = vadd.f32 %v708_v27, %v148_v25  ;;  %v306_v29 = vpop.f32.mrb[15].mxu0  ;;  %718 = vmatpush3.bf16.msra.mxu1 %v338_v21  ;;  %v332_v31 = vmax.f32 %v312_v23, 0.0  ;;  %v380_v3 = vpop.permute.xlu0 %379 }
  0xf5   :  { %v307_v30 = vadd.f32 %v306_v29, %v138_v13  ;;  %719 = vmatprep.subr.bf16.mxu1 %v339_v19  ;;  %v330_v33 = vmax.f32 %v304_v26, 0.0 }
  0xf6   :  { %v333_v32 = vmax.f32 %v315_v28, 0.0 }
  0xf7   :  { %v331_v34 = vmax.f32 %v307_v30, 0.0  ;;  %v368_v52 = vpop.permute.xlu1 %367 }
  0xf8   :  { %v341_v35 = vpack.c.bf16 %v333_v32, %v332_v31  ;;  %720 = vmatpush3.bf16.msra.mxu1 %v339_v19  ;;  %v388_v17 = vpop.permute.xlu0 %387 }
  0xf9   :  { %v340_v36 = vpack.c.bf16 %v331_v34, %v330_v33 }
  0xfb   :  { %721 = vmatprep.subr.bf16.mxu1 %v340_v36  ;;  %v376_v0 = vpop.permute.xlu1 %375 }
  0xfc   :  { %722 = vmatpush3.bf16.msra.mxu1 %v340_v36  ;;  %v396_v30 = vpop.permute.xlu0 %395 }
  0xfd   :  { %723 = vmatprep.subr.bf16.mxu1 %v341_v35 }
  0xff   :  { %v384_v13 = vpop.permute.xlu1 %383 }
 0x100   :  { %724 = vmatpush3.bf16.msra.mxu1 %v341_v35 }
 0x103   :  { %726 = vmatmul.mubr.bf16.vlgmr.msra.gmra.mrb[0].mxu1 %v782_v37  ;;  %v392_v25 = vpop.permute.xlu1 %391 }
 0x104   :  { %729 = vmatprep.mubr.bf16.mxu1 %v783_v38 }
 0x107   :  { %v400_v37 = vpop.permute.xlu1 %399 }
 0x10b   :  { %730 = vmatmul.mubr.bf16.gmra.mrb[4].mxu1 %v784_v39 }
 0x10c   :  { %733 = vmatprep.mubr.bf16.mxu1 %v785_v40 }
 0x113   :  { %734 = vmatmul.mubr.bf16.gmra.mrb[8].mxu1 %v786_v41 }
 0x114   :  { %737 = vmatprep.mubr.bf16.mxu1 %v787_v42  ;;  %v404_v42 = vpop.permute.xlu0 %403 }
 0x11b   :  { %738 = vmatmul.mubr.bf16.gmra.mrb[12].mxu1 %v788_v43 }
 0x1d6   :  { %v727_v53 = vpop.f32.mrb[0].mxu1 }
 0x1d7   :  { %v497_v54 = vadd.f32 %v727_v53, %v352_v48  ;;  %v488_v55 = vpop.f32.mrb[1].mxu1 }
 0x1d8   :  { %v489_v57 = vadd.f32 %v488_v55, %v344_v47  ;;  %v728_v58 = vpop.f32.mrb[2].mxu1  ;;  %v789_v55 = vld [vmem:[%s950_s2 + $0x40] sm:$0xff]  }
 0x1d9   :  { %v500_v59 = vadd.f32 %v728_v58, %v356_v49  ;;  %v491_v60 = vpop.f32.mrb[3].mxu1  ;;  %v553_v62 = vmax.f32 %v497_v54, 0.0 }
 0x1da   :  { %v492_v61 = vadd.f32 %v491_v60, %v348_v46  ;;  %v551_v5 = vmax.f32 %v489_v57, 0.0 }
 0x1db   :  { %v554_v63 = vmax.f32 %v500_v59, 0.0 }
 0x1dc   :  { %v552_v1 = vmax.f32 %v492_v61, 0.0 }
 0x1dd   :  { %v568_v2 = vpack.c.bf16 %v554_v63, %v553_v62 }
 0x1de   :  { %v567_v4 = vpack.c.bf16 %v552_v1, %v551_v5  ;;  %v731_v6 = vpop.f32.mrb[4].mxu1 }
 0x1df   :  { %v513_v7 = vadd.f32 %v731_v6, %v368_v52  ;;  %v504_v8 = vpop.f32.mrb[5].mxu1 }
 0x1e0   :  { %v505_v9 = vadd.f32 %v504_v8, %v360_v50  ;;  %v732_v10 = vpop.f32.mrb[6].mxu1  ;;  %742 = vmatpush3.bf16.msra.mxu0 %v567_v4 }
 0x1e1   :  { %v516_v11 = vadd.f32 %v732_v10, %v372_v56  ;;  %v507_v12 = vpop.f32.mrb[7].mxu1  ;;  %743 = vmatprep.subr.bf16.mxu0 %v792_v44  ;;  %v557_v15 = vmax.f32 %v513_v7, 0.0  ;;  %v623_v56 = vpop.permute.xlu1 %622 }
 0x1e2   :  { %v508_v14 = vadd.f32 %v507_v12, %v364_v51  ;;  %v555_v18 = vmax.f32 %v505_v9, 0.0 }
 0x1e3   :  { %v558_v16 = vmax.f32 %v516_v11, 0.0 }
 0x1e4   :  { %v556_v19 = vmax.f32 %v508_v14, 0.0  ;;  %744 = vmatpush3.bf16.msra.mxu0 %v568_v2 }
 0x1e5   :  { %v570_v20 = vpack.c.bf16 %v558_v16, %v557_v15  ;;  %745 = vmatprep.subr.bf16.mxu0 %v792_v44 }
 0x1e6   :  { %v569_v21 = vpack.c.bf16 %v556_v19, %v555_v18  ;;  %v735_v22 = vpop.f32.mrb[8].mxu1 }
 0x1e7   :  { %v529_v23 = vadd.f32 %v735_v22, %v384_v13  ;;  %v520_v24 = vpop.f32.mrb[9].mxu1 }
 0x1e8   :  { %v521_v26 = vadd.f32 %v520_v24, %v376_v0  ;;  %v736_v27 = vpop.f32.mrb[10].mxu1  ;;  %746 = vmatpush3.bf16.msra.mxu0 %v569_v21 }
 0x1e9   :  { %v532_v28 = vadd.f32 %v736_v27, %v388_v17  ;;  %v523_v29 = vpop.f32.mrb[11].mxu1  ;;  %747 = vmatprep.subr.bf16.mxu0 %v792_v44  ;;  %v561_v32 = vmax.f32 %v529_v23, 0.0 }
 0x1ea   :  { %v524_v31 = vadd.f32 %v523_v29, %v380_v3  ;;  %v559_v34 = vmax.f32 %v521_v26, 0.0 }
 0x1eb   :  { %v562_v33 = vmax.f32 %v532_v28, 0.0 }
 0x1ec   :  { %v560_v35 = vmax.f32 %v524_v31, 0.0  ;;  %748 = vmatpush3.bf16.msra.mxu0 %v570_v20 }
 0x1ed   :  { %v572_v36 = vpack.c.bf16 %v562_v33, %v561_v32  ;;  %749 = vmatprep.subr.bf16.mxu0 %v792_v44 }
 0x1ee   :  { %v571_v38 = vpack.c.bf16 %v560_v35, %v559_v34  ;;  %v739_v39 = vpop.f32.mrb[12].mxu1 }
 0x1ef   :  { %v545_v40 = vadd.f32 %v739_v39, %v400_v37  ;;  %v536_v41 = vpop.f32.mrb[13].mxu1 }
 0x1f0   :  { %v537_v43 = vadd.f32 %v536_v41, %v392_v25  ;;  %v740_v45 = vpop.f32.mrb[14].mxu1  ;;  %750 = vmatpush3.bf16.msra.mxu0 %v571_v38 }
 0x1f1   :  { %v548_v46 = vadd.f32 %v740_v45, %v404_v42  ;;  %v539_v47 = vpop.f32.mrb[15].mxu1  ;;  %751 = vmatprep.subr.bf16.mxu0 %v792_v44  ;;  %v565_v49 = vmax.f32 %v545_v40, 0.0 }
 0x1f2   :  { %v540_v48 = vadd.f32 %v539_v47, %v396_v30  ;;  %v563_v51 = vmax.f32 %v537_v43, 0.0 }
 0x1f3   :  { %v566_v50 = vmax.f32 %v548_v46, 0.0 }
 0x1f4   :  { %v564_v52 = vmax.f32 %v540_v48, 0.0  ;;  %752 = vmatpush3.bf16.msra.mxu0 %v572_v36 }
 0x1f5   :  { %v574_v53 = vpack.c.bf16 %v566_v50, %v565_v49  ;;  %753 = vmatprep.subr.bf16.mxu0 %v792_v44 }
 0x1f6   :  { %v573_v54 = vpack.c.bf16 %v564_v52, %v563_v51 }
 0x1f8   :  { %754 = vmatpush3.bf16.msra.mxu0 %v573_v54 }
 0x1f9   :  { %755 = vmatprep.subr.bf16.mxu0 %v792_v44 }
 0x1fc   :  { %756 = vmatpush3.bf16.msra.mxu0 %v574_v53 }
 0x1ff   :  { %758 = vmatmul.mubr.bf16.vlgmr.msra.gmra.mrb[16].mxu0 %v789_v55 }
 0x2d2   :  { %v615_v57 = vpop.f32.mrb[16].mxu0 }
 0x2d3   :  { %v625_v58 = vadd.f32 %v623_v56, %v615_v57  ;;  %v759_v59 = vpop.f32.mrb[17].mxu0 }
 0x2d4   :  { %v618_v60 = vpop.f32.mrb[18].mxu0 }
 0x2d5   :  { %626 = vst [vmem:[%s951_s4] sm:$0xff] %v625_v58  ;;  %v760_v61 = vpop.f32.mrb[19].mxu0 }

</bundles_post_ra>
